<compile_context>
chip_gen: v6e
topology: v6e:2x2x1
jax: 0.10.0
libtpu: 0.0.40
codegen_flags: <defaults>
</compile_context>

<pallas_src>
import math

import jax
import jax.numpy as jnp
from jax import lax
from jax.experimental import pallas as pl
from jax.experimental.pallas import tpu as pltpu

_LANE = 128

# PyTorch F.gelu default = exact erf GELU.  erf lowers to a long VPU polynomial
# on TPU (the dominant compute cost here); tanh goes to the EUP (free slot).
# Deviation is ~1e-3 absolute — flagged for the author; set False for exact.
_USE_TANH_GELU = True


def _round_up(n, m):
    return ((n + m - 1) // m) * m


def _gelu_exact(x):
    return 0.5 * x * (1.0 + lax.erf(x * (1.0 / math.sqrt(2.0))))


def _gelu_kernel(x):
    if _USE_TANH_GELU:
        return jax.nn.gelu(x, approximate=True)
    return _gelu_exact(x)


def _ebm_kernel(z_ref, w1_ref, b1_ref, w2_ref, b2_ref, w3_ref, b3_ref, o_ref):
    # Layer 1: Linear(latent -> inner) + GELU.  bf16 MXU operands, f32 acc,
    # f32 elementwise (v5e VPU has no bf16 path).
    z = z_ref[...].astype(jnp.bfloat16)
    h = jnp.dot(z, w1_ref[...], preferred_element_type=jnp.float32)
    h = _gelu_kernel(h + b1_ref[...])
    # Inner block (num_layers = 1): Linear(inner -> inner) + GELU.
    h = jnp.dot(h.astype(jnp.bfloat16), w2_ref[...],
                preferred_element_type=jnp.float32)
    h = _gelu_kernel(h + b2_ref[...])
    # Final Linear(inner -> 1): VPU multiply + XLU lane reduction.
    e = jnp.sum(h * w3_ref[...], axis=-1, keepdims=True) + b3_ref[...]
    # Compact (bm, 1) store: output HBM traffic is batch*4 bytes (was 128x that).
    o_ref[...] = e


def init_params(key, latent_dim=100, inner_dim=200, out_dim=1):
    """f32, unpadded params mimicking nn.Linear's U(-1/sqrt(fan_in), 1/sqrt(fan_in)).

    Weights stored (in_features, out_features); biases as (1, out_features).
    """
    ks = jax.random.split(key, 6)

    def lin(kw, kb, fan_in, fan_out):
        bound = 1.0 / math.sqrt(fan_in)
        w = jax.random.uniform(kw, (fan_in, fan_out), jnp.float32, -bound, bound)
        b = jax.random.uniform(kb, (1, fan_out), jnp.float32, -bound, bound)
        return w, b

    w1, b1 = lin(ks[0], ks[1], latent_dim, inner_dim)
    w2, b2 = lin(ks[2], ks[3], inner_dim, inner_dim)
    w3, b3 = lin(ks[4], ks[5], inner_dim, out_dim)
    return (w1, b1, w2, b2, w3, b3)


def prepare_params(params, *, latent_dim=100, inner_dim=200, out_dim=1):
    """One-time conversion to kernel layout: lane-padded inner dim + bf16 weights."""
    assert out_dim == 1, "kernel implements the default out_dim=1 energy head"
    w1, b1, w2, b2, w3, b3 = params
    ip = _round_up(inner_dim, _LANE)    # 200 -> 256

    # Keep the first-layer contraction at latent_dim (100): no MXU benefit to
    # padding K, and it would only add zero-DMA for w1.
    w1p = jnp.zeros((latent_dim, ip), jnp.bfloat16).at[:, :inner_dim].set(
        w1.astype(jnp.bfloat16))
    b1p = jnp.zeros((1, ip), jnp.float32).at[:, :inner_dim].set(b1.astype(jnp.float32))
    w2p = jnp.zeros((ip, ip), jnp.bfloat16).at[:inner_dim, :inner_dim].set(
        w2.astype(jnp.bfloat16))
    b2p = jnp.zeros((1, ip), jnp.float32).at[:, :inner_dim].set(b2.astype(jnp.float32))
    # Final layer kept in f32 as a (1, inner) row for the VPU-reduce path.
    w3p = jnp.zeros((1, ip), jnp.float32).at[0, :inner_dim].set(w3[:, 0].astype(jnp.float32))
    b3p = b3.reshape(1, 1).astype(jnp.float32)
    return (w1p, b1p, w2p, b2p, w3p, b3p)


def _pick_block(batch):
    if batch >= 256:
        # Large batch: big blocks amortize per-grid-step overhead (~0.35us),
        # capped so there are always >=2 grid steps (v7x has 2 TensorCores and
        # the "parallel" batch axis is what shards work across them).
        return min(1024, _round_up(pl.cdiv(batch, 2), _LANE))
    if batch >= 16:
        return _round_up(batch, 16)
    return _round_up(max(batch, 1), 8)


def e_func_forward(z, kernel_params, *, latent_dim=100, out_dim=1):
    """E_func forward: z.view(-1, latent_dim) -> MLP -> view(-1, out_dim, 1, 1)."""
    assert out_dim == 1
    w1, b1, w2, b2, w3, b3 = kernel_params
    ip = w1.shape[1]

    # No pad/cast pass over z: fed to the kernel unpadded (cast happens in-kernel).
    z2d = z.reshape(-1, latent_dim)
    batch = z2d.shape[0]

    bm = _pick_block(batch)
    grid = (pl.cdiv(batch, bm),)

    nbytes = lambda a: int(a.size) * a.dtype.itemsize
    cost = pl.CostEstimate(
        flops=int(2 * batch * (latent_dim * ip + ip * ip + ip)),
        transcendentals=int(2 * batch * ip),
        bytes_accessed=int(nbytes(z2d) + nbytes(w1) + nbytes(b1) + nbytes(w2)
                           + nbytes(b2) + nbytes(w3) + nbytes(b3) + batch * 4),
    )

    out = pl.pallas_call(
        _ebm_kernel,
        out_shape=jax.ShapeDtypeStruct((batch, 1), jnp.float32),
        grid=grid,
        in_specs=[
            pl.BlockSpec((bm, latent_dim), lambda i: (i, 0)),   # z rows
            pl.BlockSpec((latent_dim, ip), lambda i: (0, 0)),   # w1 (resident)
            pl.BlockSpec((1, ip), lambda i: (0, 0)),            # b1
            pl.BlockSpec((ip, ip), lambda i: (0, 0)),           # w2 (resident)
            pl.BlockSpec((1, ip), lambda i: (0, 0)),            # b2
            pl.BlockSpec((1, ip), lambda i: (0, 0)),            # w3 row
            pl.BlockSpec((1, 1), lambda i: (0, 0)),             # b3
        ],
        out_specs=pl.BlockSpec((bm, 1), lambda i: (i, 0)),
        compiler_params=pltpu.CompilerParams(
            dimension_semantics=("parallel",),
        ),
        cost_estimate=cost,
    )(z2d, w1, b1, w2, b2, w3, b3)

    return out.reshape(-1, out_dim, 1, 1)


def e_func_reference(z, params, *, latent_dim=100, out_dim=1):
    """Pure-JAX f32 reference with PyTorch semantics (exact erf GELU)."""
    w1, b1, w2, b2, w3, b3 = params
    z2d = z.reshape(-1, latent_dim).astype(jnp.float32)
    h = _gelu_exact(z2d @ w1 + b1)
    h = _gelu_exact(h @ w2 + b2)
    out = h @ w3 + b3
    return out.reshape(-1, out_dim, 1, 1)


# TODO(synk): batchnorm=True variant (BatchNorm1d between layers) is not implemented;
# this kernel covers the module's default batchnorm=False path.

if __name__ == "__main__":
    latent_dim, inner_dim, out_dim = 100, 200, 1
    batch = 8

    key = jax.random.PRNGKey(0)
    k_params, k_z = jax.random.split(key)
    params = init_params(k_params, latent_dim, inner_dim, out_dim)
    kparams = prepare_params(params, latent_dim=latent_dim, inner_dim=inner_dim,
                             out_dim=out_dim)

    # NCHW latent like the PyTorch module expects: (B, latent_dim, 1, 1).
    z = jax.random.normal(k_z, (batch, latent_dim, 1, 1), jnp.float32)

    out = e_func_forward(z, kparams, latent_dim=latent_dim, out_dim=out_dim)
    out = jax.block_until_ready(out)

    ref = e_func_reference(z, params, latent_dim=latent_dim, out_dim=out_dim)
    assert out.shape == (batch, out_dim, 1, 1), out.shape
    # bf16 matmul operands + tanh-approx GELU => loosened tolerance vs f32/erf ref.
    assert jnp.allclose(out, ref, atol=5e-2, rtol=5e-2), float(
        jnp.max(jnp.abs(out - ref)))

    # Also exercise the multi-block / partial-last-block path (grid > 1).
    batch2 = 300
    z2 = jax.random.normal(jax.random.PRNGKey(1), (batch2, latent_dim, 1, 1),
                           jnp.float32)
    out2 = jax.block_until_ready(
        e_func_forward(z2, kparams, latent_dim=latent_dim, out_dim=out_dim))
    ref2 = e_func_reference(z2, params, latent_dim=latent_dim, out_dim=out_dim)
    assert out2.shape == (batch2, out_dim, 1, 1), out2.shape
    assert jnp.allclose(out2, ref2, atol=5e-2, rtol=5e-2), float(
        jnp.max(jnp.abs(out2 - ref2)))

    print("KERNEL_OK")
</pallas_src>

<mosaic_0001>
module attributes {stable_mosaic.version = 11 : i64} {
  func.func @_ebm_kernel(%arg0: i32, %arg1: memref<8x100xf32, #tpu.memory_space<vmem>>, %arg2: memref<100x256xbf16, #tpu.memory_space<vmem>>, %arg3: memref<1x256xf32, #tpu.memory_space<vmem>>, %arg4: memref<256x256xbf16, #tpu.memory_space<vmem>>, %arg5: memref<1x256xf32, #tpu.memory_space<vmem>>, %arg6: memref<1x256xf32, #tpu.memory_space<vmem>>, %arg7: memref<1x1xf32, #tpu.memory_space<vmem>>, %arg8: memref<8x1xf32, #tpu.memory_space<vmem>>) attributes {dimension_semantics = [#tpu.dimension_semantics<parallel>], iteration_bounds = array<i64: 1>, scalar_prefetch = 0 : i64, scratch_operands = 0 : i64, tpu.core_type = #tpu.core_type<tc>, window_params = [{transform_indices = @transform_0, window_bounds = array<i64: 8, 100>}, {pipeline_mode = #tpu.pipeline_mode<synchronous>, transform_indices = @transform_1, window_bounds = array<i64: 100, 256>}, {pipeline_mode = #tpu.pipeline_mode<synchronous>, transform_indices = @transform_2, window_bounds = array<i64: 1, 256>}, {pipeline_mode = #tpu.pipeline_mode<synchronous>, transform_indices = @transform_3, window_bounds = array<i64: 256, 256>}, {pipeline_mode = #tpu.pipeline_mode<synchronous>, transform_indices = @transform_4, window_bounds = array<i64: 1, 256>}, {pipeline_mode = #tpu.pipeline_mode<synchronous>, transform_indices = @transform_5, window_bounds = array<i64: 1, 256>}, {pipeline_mode = #tpu.pipeline_mode<synchronous>, transform_indices = @transform_6, window_bounds = array<i64: 1, 1>}, {transform_indices = @transform_7, window_bounds = array<i64: 8, 1>}]} {
    %c0 = arith.constant 0 : index
    %c0_0 = arith.constant 0 : index
    %0 = vector.load %arg1[%c0, %c0_0] : memref<8x100xf32, #tpu.memory_space<vmem>>, vector<8x100xf32>
    %1 = arith.truncf %0 : vector<8x100xf32> to vector<8x100xbf16>
    %c0_1 = arith.constant 0 : index
    %c0_2 = arith.constant 0 : index
    %2 = vector.load %arg2[%c0_1, %c0_2] : memref<100x256xbf16, #tpu.memory_space<vmem>>, vector<100x256xbf16>
    %cst = arith.constant dense<0.000000e+00> : vector<8x256xf32>
    %3 = tpu.matmul %1, %2, %cst {dimension_numbers = #tpu.dot_dimension_numbers<[1], [0], [0], [1], [0, 0, 1, 1], [], []>} : vector<8x100xbf16>, vector<100x256xbf16>, vector<8x256xf32> -> vector<8x256xf32>
    %c0_3 = arith.constant 0 : index
    %c0_4 = arith.constant 0 : index
    %4 = vector.load %arg3[%c0_3, %c0_4] : memref<1x256xf32, #tpu.memory_space<vmem>>, vector<1x256xf32>
    %5 = vector.broadcast %4 : vector<1x256xf32> to vector<8x256xf32>
    %6 = arith.addf %3, %5 : vector<8x256xf32>
    %7 = arith.mulf %6, %6 : vector<8x256xf32>
    %8 = arith.mulf %6, %7 : vector<8x256xf32>
    %cst_5 = arith.constant 4.471500e-02 : f32
    %9 = vector.broadcast %cst_5 : f32 to vector<8x256xf32>
    %10 = arith.mulf %9, %8 : vector<8x256xf32>
    %11 = arith.addf %6, %10 : vector<8x256xf32>
    %cst_6 = arith.constant 0.797884583 : f32
    %12 = vector.broadcast %cst_6 : f32 to vector<8x256xf32>
    %13 = arith.mulf %12, %11 : vector<8x256xf32>
    %14 = math.tanh %13 : vector<8x256xf32>
    %cst_7 = arith.constant 1.000000e+00 : f32
    %15 = vector.broadcast %cst_7 : f32 to vector<8x256xf32>
    %16 = arith.addf %15, %14 : vector<8x256xf32>
    %cst_8 = arith.constant 5.000000e-01 : f32
    %17 = vector.broadcast %cst_8 : f32 to vector<8x256xf32>
    %18 = arith.mulf %17, %16 : vector<8x256xf32>
    %19 = arith.mulf %6, %18 : vector<8x256xf32>
    %20 = arith.truncf %19 : vector<8x256xf32> to vector<8x256xbf16>
    %c0_9 = arith.constant 0 : index
    %c0_10 = arith.constant 0 : index
    %21 = vector.load %arg4[%c0_9, %c0_10] : memref<256x256xbf16, #tpu.memory_space<vmem>>, vector<256x256xbf16>
    %cst_11 = arith.constant dense<0.000000e+00> : vector<8x256xf32>
    %22 = tpu.matmul %20, %21, %cst_11 {dimension_numbers = #tpu.dot_dimension_numbers<[1], [0], [0], [1], [0, 0, 1, 1], [], []>} : vector<8x256xbf16>, vector<256x256xbf16>, vector<8x256xf32> -> vector<8x256xf32>
    %c0_12 = arith.constant 0 : index
    %c0_13 = arith.constant 0 : index
    %23 = vector.load %arg5[%c0_12, %c0_13] : memref<1x256xf32, #tpu.memory_space<vmem>>, vector<1x256xf32>
    %24 = vector.broadcast %23 : vector<1x256xf32> to vector<8x256xf32>
    %25 = arith.addf %22, %24 : vector<8x256xf32>
    %26 = arith.mulf %25, %25 : vector<8x256xf32>
    %27 = arith.mulf %25, %26 : vector<8x256xf32>
    %cst_14 = arith.constant 4.471500e-02 : f32
    %28 = vector.broadcast %cst_14 : f32 to vector<8x256xf32>
    %29 = arith.mulf %28, %27 : vector<8x256xf32>
    %30 = arith.addf %25, %29 : vector<8x256xf32>
    %cst_15 = arith.constant 0.797884583 : f32
    %31 = vector.broadcast %cst_15 : f32 to vector<8x256xf32>
    %32 = arith.mulf %31, %30 : vector<8x256xf32>
    %33 = math.tanh %32 : vector<8x256xf32>
    %cst_16 = arith.constant 1.000000e+00 : f32
    %34 = vector.broadcast %cst_16 : f32 to vector<8x256xf32>
    %35 = arith.addf %34, %33 : vector<8x256xf32>
    %cst_17 = arith.constant 5.000000e-01 : f32
    %36 = vector.broadcast %cst_17 : f32 to vector<8x256xf32>
    %37 = arith.mulf %36, %35 : vector<8x256xf32>
    %38 = arith.mulf %25, %37 : vector<8x256xf32>
    %c0_18 = arith.constant 0 : index
    %c0_19 = arith.constant 0 : index
    %39 = vector.load %arg6[%c0_18, %c0_19] : memref<1x256xf32, #tpu.memory_space<vmem>>, vector<1x256xf32>
    %40 = vector.broadcast %39 : vector<1x256xf32> to vector<8x256xf32>
    %41 = arith.mulf %38, %40 : vector<8x256xf32>
    %cst_20 = arith.constant dense<0.000000e+00> : vector<8xf32>
    %42 = vector.multi_reduction <add>, %41, %cst_20 [1] : vector<8x256xf32> to vector<8xf32>
    %43 = vector.shape_cast %42 : vector<8xf32> to vector<8x1xf32>
    %c0_21 = arith.constant 0 : index
    %c0_22 = arith.constant 0 : index
    %44 = vector.load %arg7[%c0_21, %c0_22] : memref<1x1xf32, #tpu.memory_space<vmem>>, vector<1x1xf32>
    %45 = vector.broadcast %44 : vector<1x1xf32> to vector<8x1xf32>
    %46 = arith.addf %43, %45 : vector<8x1xf32>
    %c0_23 = arith.constant 0 : index
    %c0_24 = arith.constant 0 : index
    %47 = vector.load %arg8[%c0_23, %c0_24] : memref<8x1xf32, #tpu.memory_space<vmem>>, vector<8x1xf32>
    tpu.vector_store %arg8[%c0_23, %c0_24], %46 {strides = array<i32>} : memref<8x1xf32, #tpu.memory_space<vmem>>, vector<8x1xf32>,
    return
  }
  func.func @transform_0(%arg0: i32) -> (i32, i32) {
    %c0_i32 = arith.constant 0 : i32
    %c0_i32_0 = arith.constant 0 : i32
    return %arg0, %c0_i32 : i32, i32
  }
  func.func @transform_1(%arg0: i32) -> (i32, i32) {
    %c0_i32 = arith.constant 0 : i32
    %c0_i32_0 = arith.constant 0 : i32
    %c0_i32_1 = arith.constant 0 : i32
    return %c0_i32, %c0_i32_0 : i32, i32
  }
  func.func @transform_2(%arg0: i32) -> (i32, i32) {
    %c0_i32 = arith.constant 0 : i32
    %c0_i32_0 = arith.constant 0 : i32
    %c0_i32_1 = arith.constant 0 : i32
    return %c0_i32, %c0_i32_0 : i32, i32
  }
  func.func @transform_3(%arg0: i32) -> (i32, i32) {
    %c0_i32 = arith.constant 0 : i32
    %c0_i32_0 = arith.constant 0 : i32
    %c0_i32_1 = arith.constant 0 : i32
    return %c0_i32, %c0_i32_0 : i32, i32
  }
  func.func @transform_4(%arg0: i32) -> (i32, i32) {
    %c0_i32 = arith.constant 0 : i32
    %c0_i32_0 = arith.constant 0 : i32
    %c0_i32_1 = arith.constant 0 : i32
    return %c0_i32, %c0_i32_0 : i32, i32
  }
  func.func @transform_5(%arg0: i32) -> (i32, i32) {
    %c0_i32 = arith.constant 0 : i32
    %c0_i32_0 = arith.constant 0 : i32
    %c0_i32_1 = arith.constant 0 : i32
    return %c0_i32, %c0_i32_0 : i32, i32
  }
  func.func @transform_6(%arg0: i32) -> (i32, i32) {
    %c0_i32 = arith.constant 0 : i32
    %c0_i32_0 = arith.constant 0 : i32
    %c0_i32_1 = arith.constant 0 : i32
    return %c0_i32, %c0_i32_0 : i32, i32
  }
  func.func @transform_7(%arg0: i32) -> (i32, i32) {
    %c0_i32 = arith.constant 0 : i32
    %c0_i32_0 = arith.constant 0 : i32
    return %arg0, %c0_i32 : i32, i32
  }
}

</mosaic_0001>

<bundles_post_ra>
// kernel: tpu_custom_call.1
= control target key start
LH: loop header
LB: loop body
LE: loop exit
PB: predicated region body
PF: predicated region fallthrough
CT: control target
= control target key end

     0   :  { %s803_s0 = inlined_call_operand.hbm [shape: f32[8,100], index: 0, kind: input, shape index: {}]   ;;  %s804_s1 = inlined_call_operand.hbm [shape: bf16[100,256], index: 1, kind: input, shape index: {}]   ;;  %s805_s2 = inlined_call_operand.vmem [shape: f32[1,256], index: 2, kind: input, shape index: {}]   ;;  %s806_s3 = inlined_call_operand.hbm [shape: bf16[256,256], index: 3, kind: input, shape index: {}]   ;;  %s807_s4 = inlined_call_operand.vmem [shape: f32[1,256], index: 4, kind: input, shape index: {}]   ;;  %s808_s5 = inlined_call_operand.vmem [shape: f32[1,256], index: 5, kind: input, shape index: {}]   ;;  %s809_s6 = inlined_call_operand.<no memory space> [shape: f32[1,1], index: 6, kind: input, shape index: {}]   ;;  %s810_s7 = inlined_call_operand.vmem [shape: f32[8,1], index: 7, kind: output, shape index: {}]  }
   0x1   :  { %v12_v0 = vstv %s809_s6 }
   0x2   :  { %13 = vst [vmem:[#allocation2] sm:$0x1] %v12_v0 }
   0x3   :  { %14 = vsyncpa [#allocation4], 0 }
   0x4   :  { %15 = vsyncpa [#allocation6], 0  ;;  %s723_s26 = smov [#allocation5]  }
   0x5   :  { %s31_s27 = sshll.u32 %s723_s26, 4  ;;  %s32_s27 = int_to_ptr.vmem [resolvable:$true] %s31_s27 }
   0x6   :  { %s667_s28 = scalar_lea.vmem %s32_s27, 1664  ;;  %p672_p1 = scmp.lt.s32.totalorder %s32_s27, %s32_s27 }
   0x7   :  { %p668_p0 = scmp.ne.s32.totalorder %s32_s27, %s667_s28  ;;  %p673_p2 = scmp.lt.s32.totalorder %s667_s28, %s667_s28 }
   0x9   :  { %p674_p3 = por %p673_p2, %p672_p1 }
   0xb   :  { %p675_p4 = pnand %p674_p3, %p668_p0 }
   0xd   :  { %678 = shalt.err (!%p675_p4)
}
   0xe   :  { %s724_s29 = smov 128   ;;  %s725_s30 = smov 8  }
   0xf   :  { %37 = dma.hbm_to_vmem [thread:$0]  %s804_s1, 1664, %s32_s27, [#allocation6], %s724_s29, %s724_s29, %s725_s30  }
  0x10   :  { %s726_s6 = smov [#allocation3]   ;;  %s727_s11 = smov [#allocation7]  }
  0x11   :  { %s22_s10 = sshll.u32 %s726_s6, 4  ;;  %s45_s12 = sshll.u32 %s727_s11, 4  ;;  %s23_s10 = int_to_ptr.vmem [resolvable:$true] %s22_s10  ;;  %s46_s12 = int_to_ptr.vmem [resolvable:$true] %s45_s12 }
  0x12   :  { %s687_s13 = scalar_lea.vmem %s23_s10, 128  ;;  %p692_p6 = scmp.lt.s32.totalorder %s23_s10, %s23_s10 }
  0x13   :  { %p688_p5 = scmp.ne.s32.totalorder %s23_s10, %s687_s13  ;;  %p693_p7 = scmp.lt.s32.totalorder %s687_s13, %s687_s13 }
  0x15   :  { %p694_p8 = por %p693_p7, %p692_p6 }
  0x17   :  { %p695_p9 = pnand %p694_p8, %p688_p5 }
  0x19   :  { %698 = shalt.err (!%p695_p9)
}
  0x1a   :  { %25 = dma.hbm_to_vmem [thread:$0]  %s803_s0, 128, %s23_s10, [#allocation4]  }
  0x1b   :  { %s707_s16 = scalar_lea.vmem %s46_s12, 4096  ;;  %p712_p11 = scmp.lt.s32.totalorder %s46_s12, %s46_s12 }
  0x1c   :  { %p708_p10 = scmp.ne.s32.totalorder %s46_s12, %s707_s16  ;;  %p713_p12 = scmp.lt.s32.totalorder %s707_s16, %s707_s16 }
  0x1e   :  { %p714_p13 = por %p713_p12, %p712_p11 }
  0x20   :  { %p715_p0 = pnand %p714_p13, %p708_p10 }
  0x22   :  { %718 = shalt.err (!%p715_p0)
}
  0x23   :  { %51 = dma.hbm_to_vmem [thread:$0]  %s806_s3, 4096, %s46_s12, [#allocation6], %s724_s29, %s724_s29, %s725_s30  }
  0x24   :  { %719 = dma.done.wait [#allocation4], 128  }
  0x25   :  { %720 = vsyncadd [#allocation4], 4294967168 }
  0x26   :  { %721 = dma.done.wait [#allocation6], 5760  }
  0x27   :  { %722 = vsyncadd [#allocation6], 4294961536  ;;  %v728_v1 = vmov 0   ;;  %v82_v2 = vld [vmem:[#allocation5 + $0x60] sm:$0x33]  ;;  %vm164_vm0 = vcmask 1041408   ;;  %v85_v52 = vlaneseq }
  0x28   :  { %203 = vmatprep.mubr.bf16.mxu0 %v728_v1  ;;  %v541_v3 = vcombine.high %v82_v2, %v82_v2  ;;  %v540_v4 = vcombine.low %v82_v2, %v82_v2  ;;  %v585_v5 = vld [vmem:[#allocation5 + $0x54] ss:$8 sps:$4 sm:$0xff]   ;;  %v587_v7 = vld [vmem:[#allocation5 + $0x50] ss:$8 sps:$4 sm:$0xff]   ;;  %v588_v8 = vld [vmem:[#allocation5 + $0x44] ss:$8 sps:$4 sm:$0xff]  }
  0x29   :  { %v590_v9 = vld [vmem:[#allocation5 + $0x40] ss:$8 sps:$4 sm:$0xff]   ;;  %v591_v10 = vld [vmem:[#allocation5 + $0x34] ss:$8 sps:$4 sm:$0xff]   ;;  %v593_v14 = vld [vmem:[#allocation5 + $0x30] ss:$8 sps:$4 sm:$0xff]  }
  0x2a   :  { %542 = vmatprep.subr.msk.bf16.mxu0 %vm164_vm0, %v541_v3  ;;  %v166_v6 = vsel %vm164_vm0, %v540_v4, 0  ;;  %v603_v11 = vld [vmem:[#allocation7 + $0x74] ss:$8 sps:$4 sm:$0xff]   ;;  %v605_v12 = vld [vmem:[#allocation7 + $0x70] ss:$8 sps:$4 sm:$0xff]   ;;  %vm160_vm1 = vcmask 818176  }
  0x2b   :  { %174 = vmatpush1.bf16.msra.mxu0 %v166_v6  ;;  %v606_v13 = vld [vmem:[#allocation7 + $0x64] ss:$8 sps:$4 sm:$0xff]   ;;  %436 = vmatprep.subr.bf16.mxu1 %v603_v11  ;;  %v608_v15 = vld [vmem:[#allocation7 + $0x60] ss:$8 sps:$4 sm:$0xff]   ;;  %v609_v17 = vld [vmem:[#allocation7 + $0x54] ss:$8 sps:$4 sm:$0xff]  }
  0x2c   :  { %175 = vmatprep.subr.bf16.mxu0 %v585_v5  ;;  %437 = vmatpush1.bf16.msra.mxu1 %v605_v12  ;;  %v594_v16 = vld [vmem:[#allocation5 + $0x24] ss:$8 sps:$4 sm:$0xff]   ;;  %v596_v18 = vld [vmem:[#allocation5 + $0x20] ss:$8 sps:$4 sm:$0xff]   ;;  %v597_v20 = vld [vmem:[#allocation5 + $0x14] ss:$8 sps:$4 sm:$0xff]  }
  0x2d   :  { %438 = vmatprep.subr.bf16.mxu1 %v606_v13  ;;  %v611_v19 = vld [vmem:[#allocation7 + $0x50] ss:$8 sps:$4 sm:$0xff]   ;;  %v612_v21 = vld [vmem:[#allocation7 + $0x44] ss:$8 sps:$4 sm:$0xff]   ;;  %v614_v23 = vld [vmem:[#allocation7 + $0x40] ss:$8 sps:$4 sm:$0xff]  }
  0x2e   :  { %v599_v22 = vld [vmem:[#allocation5 + $0x10] ss:$8 sps:$4 sm:$0xff]   ;;  %v600_v24 = vld [vmem:[#allocation5 + $0x4] ss:$8 sps:$4 sm:$0xff]   ;;  %v602_v26 = vld [vmem:[#allocation5] ss:$8 sps:$4 sm:$0xff]  }
  0x2f   :  { %176 = vmatpush1.bf16.msra.mxu0 %v587_v7  ;;  %v615_v25 = vld [vmem:[#allocation7 + $0x34] ss:$8 sps:$4 sm:$0xff]   ;;  %v617_v28 = vld [vmem:[#allocation7 + $0x30] ss:$8 sps:$4 sm:$0xff]   ;;  %v618_v29 = vld [vmem:[#allocation7 + $0x24] ss:$8 sps:$4 sm:$0xff]  }
  0x30   :  { %177 = vmatprep.subr.bf16.mxu0 %v588_v8  ;;  %439 = vmatpush1.bf16.msra.mxu1 %v608_v15  ;;  %v68_v27 = vld [vmem:[#allocation3] sm:$0xff]  ;;  %v620_v31 = vld [vmem:[#allocation7 + $0x20] ss:$8 sps:$4 sm:$0xff]   ;;  %v624_v34 = vld [vmem:[#allocation7 + $0x4] ss:$8 sps:$4 sm:$0xff]   ;;  %v86_v53 = vshrl.u32 %v85_v52, 7 }
  0x31   :  { %440 = vmatprep.subr.bf16.mxu1 %v609_v17  ;;  %v69_v30 = vpack.c.bf16 %v68_v27, %v68_v27  ;;  %v621_v32 = vld [vmem:[#allocation7 + $0x14] ss:$8 sps:$4 sm:$0xff]   ;;  %v623_v33 = vld [vmem:[#allocation7 + $0x10] ss:$8 sps:$4 sm:$0xff]   ;;  %v626_v35 = vld [vmem:[#allocation7] ss:$8 sps:$4 sm:$0xff]  }
  0x32   :  { %v627_v36 = vld [vmem:[#allocation7 + $0xf4] ss:$8 sps:$4 sm:$0xff]   ;;  %v629_v37 = vld [vmem:[#allocation7 + $0xf0] ss:$8 sps:$4 sm:$0xff]   ;;  %v630_v38 = vld [vmem:[#allocation7 + $0xe4] ss:$8 sps:$4 sm:$0xff]  }
  0x33   :  { %178 = vmatpush1.bf16.msra.mxu0 %v590_v9  ;;  %v632_v39 = vld [vmem:[#allocation7 + $0xe0] ss:$8 sps:$4 sm:$0xff]   ;;  %v633_v40 = vld [vmem:[#allocation7 + $0xd4] ss:$8 sps:$4 sm:$0xff]   ;;  %v635_v41 = vld [vmem:[#allocation7 + $0xd0] ss:$8 sps:$4 sm:$0xff]  }
  0x34   :  { %179 = vmatprep.subr.bf16.mxu0 %v591_v10  ;;  %441 = vmatpush1.bf16.msra.mxu1 %v611_v19  ;;  %v636_v42 = vld [vmem:[#allocation7 + $0xc4] ss:$8 sps:$4 sm:$0xff]   ;;  %v638_v43 = vld [vmem:[#allocation7 + $0xc0] ss:$8 sps:$4 sm:$0xff]   ;;  %v639_v44 = vld [vmem:[#allocation7 + $0xb4] ss:$8 sps:$4 sm:$0xff]  }
  0x35   :  { %442 = vmatprep.subr.bf16.mxu1 %v612_v21  ;;  %v641_v45 = vld [vmem:[#allocation7 + $0xb0] ss:$8 sps:$4 sm:$0xff]   ;;  %v642_v46 = vld [vmem:[#allocation7 + $0xa4] ss:$8 sps:$4 sm:$0xff]   ;;  %v644_v47 = vld [vmem:[#allocation7 + $0xa0] ss:$8 sps:$4 sm:$0xff]  }
  0x36   :  { %v645_v48 = vld [vmem:[#allocation7 + $0x94] ss:$8 sps:$4 sm:$0xff]   ;;  %v647_v49 = vld [vmem:[#allocation7 + $0x90] ss:$8 sps:$4 sm:$0xff]   ;;  %v648_v50 = vld [vmem:[#allocation7 + $0x84] ss:$8 sps:$4 sm:$0xff]  }
  0x37   :  { %180 = vmatpush1.bf16.msra.mxu0 %v593_v14  ;;  %v650_v51 = vld [vmem:[#allocation7 + $0x80] ss:$8 sps:$4 sm:$0xff]   ;;  %v781_v54 = vsub.s32 0, %v86_v53  ;;  %v83_v55 = vld [vmem:[%s805_s2] sm:$0x3]  ;;  %v786_v56 = vsub.s32 1, %v86_v53 }
  0x38   :  { %181 = vmatprep.subr.bf16.mxu0 %v594_v16  ;;  %443 = vmatpush1.bf16.msra.mxu1 %v614_v23  ;;  %v264_v21 = vld [vmem:[%s807_s4] sm:$0x3]  ;;  %vm520_vm2 = vcmask 7168  }
  0x39   :  { %444 = vmatprep.subr.bf16.mxu1 %v615_v25  ;;  %v88_v57 = vrot.slane %v83_v55, %v781_v54  ;;  %v92_v58 = vrot.slane %v83_v55, %v786_v56  ;;  %v273_v23 = vrot.slane %v264_v21, %v786_v56  ;;  %v576_v55 = vld [vmem:[#allocation2] ss:$0 sm:$0xff] }
  0x3b   :  { %182 = vmatpush1.bf16.msra.mxu0 %v596_v18 }
  0x3c   :  { %183 = vmatprep.subr.bf16.mxu0 %v597_v20  ;;  %445 = vmatpush1.bf16.msra.mxu1 %v617_v28 }
  0x3d   :  { %446 = vmatprep.subr.bf16.mxu1 %v618_v29 }
  0x3f   :  { %184 = vmatpush1.bf16.msra.mxu0 %v599_v22  ;;  %v269_v22 = vrot.slane %v264_v21, %v781_v54 }
  0x40   :  { %185 = vmatprep.subr.bf16.mxu0 %v600_v24  ;;  %447 = vmatpush1.bf16.msra.mxu1 %v620_v31 }
  0x41   :  { %448 = vmatprep.subr.bf16.mxu1 %v621_v32 }
  0x43   :  { %186 = vmatpush1.bf16.msra.mxu0 %v602_v26 }
  0x44   :  { %449 = vmatpush1.bf16.msra.mxu1 %v623_v33 }
  0x45   :  { %450 = vmatprep.subr.bf16.mxu1 %v624_v34 }
  0x46   :  { %543 = vmatmul.mubr.msk.bf16.vlgmr.msra.gmra.mxu0 %vm160_vm1, %v69_v30 }
  0x48   :  { %451 = vmatpush1.bf16.msra.mxu1 %v626_v35 }
  0x49   :  { %452 = vmatprep.subr.bf16.mxu1 %v627_v36 }
  0x4c   :  { %453 = vmatpush2.bf16.msra.mxu1 %v629_v37 }
  0x4d   :  { %454 = vmatprep.subr.bf16.mxu1 %v630_v38 }
  0x50   :  { %455 = vmatpush2.bf16.msra.mxu1 %v632_v39 }
  0x51   :  { %456 = vmatprep.subr.bf16.mxu1 %v633_v40 }
  0x54   :  { %457 = vmatpush2.bf16.msra.mxu1 %v635_v41 }
  0x55   :  { %458 = vmatprep.subr.bf16.mxu1 %v636_v42 }
  0x58   :  { %459 = vmatpush2.bf16.msra.mxu1 %v638_v43  ;;  %v495_v43 = vld [vmem:[%s808_s5] sm:$0x3] }
  0x59   :  { %460 = vmatprep.subr.bf16.mxu1 %v639_v44 }
  0x5c   :  { %461 = vmatpush2.bf16.msra.mxu1 %v641_v45 }
  0x5d   :  { %462 = vmatprep.subr.bf16.mxu1 %v642_v46 }
  0x60   :  { %463 = vmatpush2.bf16.msra.mxu1 %v644_v47 }
  0x61   :  { %464 = vmatprep.subr.bf16.mxu1 %v645_v48  ;;  %v500_v48 = vrot.slane %v495_v43, %v781_v54 }
  0x64   :  { %465 = vmatpush2.bf16.msra.mxu1 %v647_v49  ;;  %v504_v49 = vrot.slane %v495_v43, %v786_v56 }
  0x65   :  { %466 = vmatprep.subr.bf16.mxu1 %v648_v50 }
  0x68   :  { %467 = vmatpush2.bf16.msra.mxu1 %v650_v51 }
 0x106   :  { %v205_v59 = vpop.f32.mrf.mxu0 }
 0x107   :  { %v206_v60 = vadd.f32 %v205_v59, %v88_v57 }
 0x108   :  { %v207_v61 = vpop.f32.mrf.mxu0 }
 0x109   :  { %v212_v62 = vmul.f32 %v206_v60, %v206_v60  ;;  %v208_v63 = vadd.f32 %v207_v61, %v92_v58 }
 0x10a   :  { %v209_v0 = vpop.f32.mrf.mxu0 }
 0x10b   :  { %v214_v1 = vmul.f32 %v212_v62, %v206_v60  ;;  %v213_v2 = vmul.f32 %v208_v63, %v208_v63 }
 0x10c   :  { %v210_v3 = vpop.f32.mrf.mxu0 }
 0x10d   :  { %v216_v4 = vmul.f32 0.044715, %v214_v1  ;;  %v215_v5 = vmul.f32 %v213_v2, %v208_v63 }
 0x10f   :  { %v218_v6 = vadd.f32 %v216_v4, %v206_v60  ;;  %v217_v7 = vmul.f32 0.044715, %v215_v5 }
 0x111   :  { %v220_v8 = vmul.f32 0.7978846, %v218_v6  ;;  %v219_v9 = vadd.f32 %v217_v7, %v208_v63 }
 0x113   :  { %651 = vtanh.f32 %v220_v8  ;;  %v221_v10 = vmul.f32 0.7978846, %v219_v9 }
 0x115   :  { %653 = vtanh.f32 %v221_v10 }
 0x120   :  { %v652_v11 = vpop.eup %651 }
 0x121   :  { %v224_v12 = vadd.f32 1.0, %v652_v11 }
 0x122   :  { %v654_v13 = vpop.eup %653 }
 0x123   :  { %v225_v14 = vadd.f32 1.0, %v654_v13  ;;  %v226_v15 = vmul.f32 0.5, %v224_v12 }
 0x125   :  { %v227_v16 = vmul.f32 0.5, %v225_v14  ;;  %v228_v17 = vmul.f32 %v226_v15, %v206_v60 }
 0x127   :  { %v229_v18 = vmul.f32 %v227_v16, %v208_v63  ;;  %v230_v20 = vpack.c.bf16 %v228_v17, %v228_v17 }
 0x129   :  { %v231_v19 = vpack.c.bf16 %v229_v18, %v229_v18 }
 0x12b   :  { %468 = vmatprep.mubr.bf16.mxu1 %v231_v19 }
 0x12c   :  { %469 = vmatmul.mubr.bf16.vlgmr.msra.gmra.mxu1 %v230_v20 }
 0x1ec   :  { %v470_v24 = vpop.f32.mrf.mxu1 }
 0x1ed   :  { %v471_v25 = vadd.f32 %v470_v24, %v269_v22 }
 0x1ee   :  { %v472_v26 = vpop.f32.mrf.mxu1 }
 0x1ef   :  { %v477_v27 = vmul.f32 %v471_v25, %v471_v25  ;;  %v473_v28 = vadd.f32 %v472_v26, %v273_v23 }
 0x1f0   :  { %v474_v29 = vpop.f32.mrf.mxu1 }
 0x1f1   :  { %v479_v30 = vmul.f32 %v477_v27, %v471_v25  ;;  %v478_v31 = vmul.f32 %v473_v28, %v473_v28 }
 0x1f2   :  { %v475_v32 = vpop.f32.mrf.mxu1 }
 0x1f3   :  { %v481_v33 = vmul.f32 0.044715, %v479_v30  ;;  %v480_v34 = vmul.f32 %v478_v31, %v473_v28 }
 0x1f5   :  { %v483_v35 = vadd.f32 %v481_v33, %v471_v25  ;;  %v482_v36 = vmul.f32 0.044715, %v480_v34 }
 0x1f7   :  { %v485_v37 = vmul.f32 0.7978846, %v483_v35  ;;  %v484_v38 = vadd.f32 %v482_v36, %v473_v28 }
 0x1f9   :  { %655 = vtanh.f32 %v485_v37  ;;  %v486_v39 = vmul.f32 0.7978846, %v484_v38 }
 0x1fb   :  { %657 = vtanh.f32 %v486_v39 }
 0x206   :  { %v656_v40 = vpop.eup %655 }
 0x207   :  { %v489_v41 = vadd.f32 1.0, %v656_v40 }
 0x208   :  { %v658_v42 = vpop.eup %657 }
 0x209   :  { %v490_v44 = vadd.f32 1.0, %v658_v42  ;;  %v491_v45 = vmul.f32 0.5, %v489_v41 }
 0x20b   :  { %v492_v46 = vmul.f32 0.5, %v490_v44  ;;  %v493_v47 = vmul.f32 %v491_v45, %v471_v25 }
 0x20d   :  { %v494_v50 = vmul.f32 %v492_v46, %v473_v28  ;;  %v507_v51 = vmul.f32 %v500_v48, %v493_v47 }
 0x20f   :  { %v508_v52 = vmul.f32 %v504_v49, %v494_v50 }
 0x211   :  { %v509_v53 = vadd.f32 %v508_v52, %v507_v51 }
 0x213   :  { %510 = vadd.xlane.f32.xlu0 %v509_v53 }
 0x29c   :  { %v511_v57 = vpop.xlane.xlu0 %510 }
 0x29d   :  { %v519_v58 = vadd.f32 %v576_v55, %v511_v57 }
 0x29f   :  { %521 = vst.msk [vmem:[%s810_s7] sm:$0xff] %vm520_vm2, %v519_v58 }
 0x2a0   :  { %526 = vsyncpa [#allocation4], 1 }
 0x2a1   :  { %527 = vsyncpa [#allocation6], 1 }

</bundles_post_ra>
